<compile_context>
chip_gen: v7x
topology: tpu7x:2x2x1
jax: 0.10.0
libtpu: 0.0.40
codegen_flags: <defaults>
</compile_context>

<pallas_src>
import functools

import jax
import jax.numpy as jnp
import numpy as np
from jax import lax
from jax.experimental import pallas as pl
from jax.experimental.pallas import tpu as pltpu

DIL = 12   # dilation of conv1 / conv2
PAD = 12   # padding of conv1 / conv2 (keeps spatial size; must equal DIL)


def _make_tap_masks(l, width, height, img_s, dil):
    """9 per-tap validity masks, each (1, l) bool (None for the centre tap).

    Lane layout: images are concatenated along the lane axis, each occupying a
    contiguous img_s = H*W chunk; within an image the flat index is y*W + x.
    Tap (kh, kw) reads source pixel (y + (kh-1)*dil, x + (kw-1)*dil); the mask is
    true iff that pixel lies inside the same image."""
    lane = lax.broadcasted_iota(jnp.int32, (1, l), 1)
    pix = lane % img_s                       # flat index within the image
    col = lane % width                       # x coordinate within the row
    # row >= dil  <=>  pix >= dil*W ;  row < H - dil  <=>  pix < (H-dil)*W
    y_ok = (pix >= dil * width, None, pix < (height - dil) * width)  # dy = -d, 0, +d
    x_ok = (col >= dil,         None, col < width - dil)             # dx = -d, 0, +d
    masks = []
    for kh in range(3):
        for kw in range(3):
            my, mx = y_ok[kh], x_ok[kw]
            if my is None:
                masks.append(mx)
            elif mx is None:
                masks.append(my)
            else:
                masks.append(jnp.logical_and(my, mx))
    return masks


def _stack_taps(a, tap_masks, width, dil):
    """a: (C, L) f32. Returns (9*C, L) f32: the nine dilated-3x3 tap-shifted copies
    of `a` stacked along the K (sublane) axis, out-of-image taps zeroed.

    Each shift is a lane rotation (pltpu.roll -> XLU slot, VPU stays free); the
    precomputed masks zero every lane whose source pixel is outside its own image,
    which also removes any wrap-around / cross-image leakage from the rotation."""
    _, l = a.shape
    pieces = []
    for kh in range(3):
        for kw in range(3):
            shift = ((kh - 1) * width + (kw - 1)) * dil
            # want piece[:, p] == a[:, p + shift]; pltpu.roll follows jnp.roll
            # semantics (out[p] = in[p - amount]), so amount = (-shift) mod l.
            piece = a if shift == 0 else pltpu.roll(a, (-shift) % l, axis=1)
            m = tap_masks[kh * 3 + kw]
            if m is not None:
                piece = jnp.where(m, piece, 0.0)
            pieces.append(piece)
    return jnp.concatenate(pieces, axis=0)                 # (9*C, L) f32


def _residual_covolution_kernel(x_ref, w1_ref, b1_ref, w2_ref, b2_ref,
                                w3_ref, b3_ref, w4_ref, b4_ref,
                                out_ref, seg_ref, *, width, height, dil):
    x = x_ref[...]                                         # (Cin, L) f32
    l = x.shape[-1]
    masks = _make_tap_masks(l, width, height, width * height, dil)

    # ---- conv1: dilated 3x3 as one (Oc, 9Cin) x (9Cin, L) matmul, +bias, ReLU ----
    x1 = _stack_taps(x, masks, width, dil).astype(jnp.bfloat16)        # single cast
    dow1 = jnp.maximum(
        jnp.dot(w1_ref[...], x1, preferred_element_type=jnp.float32) + b1_ref[...],
        0.0)                                               # (Oc, L) f32

    # ---- conv2: dilated 3x3 -> seg, one (NC, 9Oc) x (9Oc, L) matmul --------------
    # (K = 144: single pass on v6e/v7x MXU; splits 128+16 on v5e -- negligible here)
    x2 = _stack_taps(dow1, masks, width, dil).astype(jnp.bfloat16)
    seg = jnp.dot(w2_ref[...], x2,
                  preferred_element_type=jnp.float32) + b2_ref[...]    # (NC, L) f32
    seg_ref[...] = seg

    # ---- conv3: 1x1, ReLU, residual add with dow1 --------------------------------
    inc1 = jnp.dot(w3_ref[...], seg.astype(jnp.bfloat16),
                   preferred_element_type=jnp.float32) + b3_ref[...]   # (Oc, L)
    add1 = dow1 + jnp.maximum(inc1, 0.0)

    # ---- conv4: 1x1, ReLU, residual add with x (unpadded lane-dense block) -------
    inc2 = jnp.dot(w4_ref[...], add1.astype(jnp.bfloat16),
                   preferred_element_type=jnp.float32) + b4_ref[...]   # (Cin, L)
    out_ref[...] = x + jnp.maximum(inc2, 0.0)


@functools.partial(jax.jit, static_argnames=("num_blocks",))
def residual_covolution(x_nchw, params, num_blocks=None):
    """x_nchw: (N, Cin, H, W) float32. params: kernel-packed weights/biases.
    Returns (out, seg) in NCHW."""
    w1, b1, w2, b2, w3, b3, w4, b4 = params
    N, Cin, H, W = x_nchw.shape
    S = H * W
    Oc = w1.shape[0]
    NC = w2.shape[0]

    if num_blocks is None:
        # 2 blocks keep both v7x TensorCores busy; on single-TC v5e/v6e pass
        # num_blocks=1 to shave one grid-step overhead.
        num_blocks = 2 if (N >= 2 and N % 2 == 0) else 1
    assert N % num_blocks == 0
    L = (N // num_blocks) * S                   # lanes per grid step (whole images)

    # Layout plumbing only: fold the batch into the lane axis so every grid step
    # processes a lane-dense (Cin, imgs*S) slab.  Per-image boundaries are handled
    # by the in-kernel tap masks.
    x_cs = jnp.transpose(x_nchw.reshape(N, Cin, S), (1, 0, 2)) \
              .reshape(Cin, N * S).astype(jnp.float32)

    kernel = functools.partial(_residual_covolution_kernel,
                               width=W, height=H, dil=DIL)

    grid_spec = pltpu.PrefetchScalarGridSpec(
        num_scalar_prefetch=0,
        grid=(num_blocks,),
        in_specs=[
            pl.BlockSpec((Cin, L), lambda b: (0, b)),      # x, lane-dense
            pl.BlockSpec((Oc, 9 * Cin), lambda b: (0, 0)), # w1 packed (Oc, 9Cin)
            pl.BlockSpec((Oc, 1), lambda b: (0, 0)),       # b1
            pl.BlockSpec((NC, 9 * Oc), lambda b: (0, 0)),  # w2 packed (NC, 9Oc)
            pl.BlockSpec((NC, 1), lambda b: (0, 0)),       # b2
            pl.BlockSpec((Oc, NC), lambda b: (0, 0)),      # w3 (1x1)
            pl.BlockSpec((Oc, 1), lambda b: (0, 0)),       # b3
            pl.BlockSpec((Cin, Oc), lambda b: (0, 0)),     # w4 (1x1)
            pl.BlockSpec((Cin, 1), lambda b: (0, 0)),      # b4
        ],
        out_specs=[
            pl.BlockSpec((Cin, L), lambda b: (0, b)),      # out (lane-dense)
            pl.BlockSpec((NC, L), lambda b: (0, b)),       # seg (lane-dense)
        ],
    )

    out_cs, seg_cs = pl.pallas_call(
        kernel,
        out_shape=(jax.ShapeDtypeStruct((Cin, N * S), jnp.float32),
                   jax.ShapeDtypeStruct((NC, N * S), jnp.float32)),
        grid_spec=grid_spec,
        compiler_params=pltpu.CompilerParams(
            dimension_semantics=("parallel",),
            vmem_limit_bytes=32 * 1024 * 1024),
    )(x_cs, w1, b1, w2, b2, w3, b3, w4, b4)

    out = jnp.transpose(out_cs.reshape(Cin, N, S), (1, 0, 2)).reshape(N, Cin, H, W)
    seg = jnp.transpose(seg_cs.reshape(NC, N, S), (1, 0, 2)).reshape(N, NC, H, W)
    return out, seg


def pack_params(w1_t, b1_t, w2_t, b2_t, w3_t, b3_t, w4_t, b4_t):
    """Repack PyTorch OIHW weights for the (C, lanes) kernel layout.

    3x3: (O, I, 3, 3) -> (O, 9*I) with column index (kh*3+kw)*I + i (matches the
    K-row order produced by _stack_taps).  1x1: (O, I, 1, 1) -> (O, I).
    Weights in bf16 (matmul operands), biases in f32 as (C, 1) columns."""
    Oc, Cin = w1_t.shape[0], w1_t.shape[1]
    NC = w2_t.shape[0]
    w1_k = jnp.transpose(w1_t, (0, 2, 3, 1)).reshape(Oc, 9 * Cin).astype(jnp.bfloat16)
    w2_k = jnp.transpose(w2_t, (0, 2, 3, 1)).reshape(NC, 9 * Oc).astype(jnp.bfloat16)
    w3_k = w3_t[:, :, 0, 0].astype(jnp.bfloat16)            # (Oc, NC)
    w4_k = w4_t[:, :, 0, 0].astype(jnp.bfloat16)            # (Cin, Oc)
    return (w1_k, b1_t.reshape(-1, 1).astype(jnp.float32),
            w2_k, b2_t.reshape(-1, 1).astype(jnp.float32),
            w3_k, b3_t.reshape(-1, 1).astype(jnp.float32),
            w4_k, b4_t.reshape(-1, 1).astype(jnp.float32))


# ------------------------- pure-JAX reference (NCHW, f32) ---------------------------
def _conv_nchw(x, w_oihw, b, dilation, padding):
    out = lax.conv_general_dilated(
        x, w_oihw, window_strides=(1, 1),
        padding=((padding, padding), (padding, padding)),
        rhs_dilation=(dilation, dilation),
        dimension_numbers=("NCHW", "OIHW", "NCHW"))
    return out + b[None, :, None, None]


def reference_forward(x, torch_params):
    w1, b1, w2, b2, w3, b3, w4, b4 = torch_params
    dow1 = jax.nn.relu(_conv_nchw(x, w1, b1, 12, 12))
    seg = _conv_nchw(dow1, w2, b2, 12, 12)
    inc1 = _conv_nchw(seg, w3, b3, 1, 0)
    add1 = dow1 + jax.nn.relu(inc1)
    inc2 = _conv_nchw(add1, w4, b4, 1, 0)
    out = x + jax.nn.relu(inc2)
    return out, seg


if __name__ == "__main__":
    # module config: Residual_Covolution(icol=8, ocol=16, num_classes=4)
    icol, ocol, num_classes = 8, 16, 4
    N, H, W = 2, 16, 16

    key = jax.random.PRNGKey(0)
    ks = jax.random.split(key, 9)

    # PyTorch-style OIHW weights, deterministic init
    w1_t = 0.1 * jax.random.normal(ks[0], (ocol, icol, 3, 3), jnp.float32)
    b1_t = 0.1 * jax.random.normal(ks[1], (ocol,), jnp.float32)
    w2_t = 0.1 * jax.random.normal(ks[2], (num_classes, ocol, 3, 3), jnp.float32)
    b2_t = 0.1 * jax.random.normal(ks[3], (num_classes,), jnp.float32)
    w3_t = 0.1 * jax.random.normal(ks[4], (ocol, num_classes, 1, 1), jnp.float32)
    b3_t = 0.1 * jax.random.normal(ks[5], (ocol,), jnp.float32)
    w4_t = 0.1 * jax.random.normal(ks[6], (icol, ocol, 1, 1), jnp.float32)
    b4_t = 0.1 * jax.random.normal(ks[7], (icol,), jnp.float32)

    x = jax.random.normal(ks[8], (N, icol, H, W), jnp.float32)

    params_k = pack_params(w1_t, b1_t, w2_t, b2_t, w3_t, b3_t, w4_t, b4_t)

    out, seg = jax.block_until_ready(residual_covolution(x, params_k))

    # sanity check against a pure-JAX f32 NCHW reference; tolerance accounts for the
    # bf16 matmul operands (accumulation is f32).
    out_ref, seg_ref = reference_forward(
        x, (w1_t, b1_t, w2_t, b2_t, w3_t, b3_t, w4_t, b4_t))
    np.testing.assert_allclose(np.asarray(out), np.asarray(out_ref),
                               rtol=2e-2, atol=2e-2)
    np.testing.assert_allclose(np.asarray(seg), np.asarray(seg_ref),
                               rtol=2e-2, atol=2e-2)

    print("KERNEL_OK")
</pallas_src>

<mosaic_0001>
module attributes {stable_mosaic.version = 11 : i64} {
  func.func @_residual_covolution_kernel(%arg0: i32, %arg1: memref<8x256xf32, #tpu.memory_space<vmem>>, %arg2: memref<16x72xbf16, #tpu.memory_space<vmem>>, %arg3: memref<16x1xf32, #tpu.memory_space<vmem>>, %arg4: memref<4x144xbf16, #tpu.memory_space<vmem>>, %arg5: memref<4x1xf32, #tpu.memory_space<vmem>>, %arg6: memref<16x4xbf16, #tpu.memory_space<vmem>>, %arg7: memref<16x1xf32, #tpu.memory_space<vmem>>, %arg8: memref<8x16xbf16, #tpu.memory_space<vmem>>, %arg9: memref<8x1xf32, #tpu.memory_space<vmem>>, %arg10: memref<8x256xf32, #tpu.memory_space<vmem>>, %arg11: memref<4x256xf32, #tpu.memory_space<vmem>>) attributes {dimension_semantics = [#tpu.dimension_semantics<parallel>], iteration_bounds = array<i64: 2>, scalar_prefetch = 0 : i64, scratch_operands = 0 : i64, tpu.core_type = #tpu.core_type<tc>, window_params = [{transform_indices = @transform_0, window_bounds = array<i64: 8, 256>}, {pipeline_mode = #tpu.pipeline_mode<synchronous>, transform_indices = @transform_1, window_bounds = array<i64: 16, 72>}, {pipeline_mode = #tpu.pipeline_mode<synchronous>, transform_indices = @transform_2, window_bounds = array<i64: 16, 1>}, {pipeline_mode = #tpu.pipeline_mode<synchronous>, transform_indices = @transform_3, window_bounds = array<i64: 4, 144>}, {pipeline_mode = #tpu.pipeline_mode<synchronous>, transform_indices = @transform_4, window_bounds = array<i64: 4, 1>}, {pipeline_mode = #tpu.pipeline_mode<synchronous>, transform_indices = @transform_5, window_bounds = array<i64: 16, 4>}, {pipeline_mode = #tpu.pipeline_mode<synchronous>, transform_indices = @transform_6, window_bounds = array<i64: 16, 1>}, {pipeline_mode = #tpu.pipeline_mode<synchronous>, transform_indices = @transform_7, window_bounds = array<i64: 8, 16>}, {pipeline_mode = #tpu.pipeline_mode<synchronous>, transform_indices = @transform_8, window_bounds = array<i64: 8, 1>}, {transform_indices = @transform_9, window_bounds = array<i64: 8, 256>}, {transform_indices = @transform_10, window_bounds = array<i64: 4, 256>}]} {
    %c0 = arith.constant 0 : index
    %c0_0 = arith.constant 0 : index
    %0 = vector.load %arg1[%c0, %c0_0] : memref<8x256xf32, #tpu.memory_space<vmem>>, vector<8x256xf32>
    %1 = tpu.iota {dimensions = array<i32: 1>} : vector<1x256xi32>
    %c256_i32 = arith.constant 256 : i32
    %c0_i32 = arith.constant 0 : i32
    %2 = arith.cmpi eq, %c256_i32, %c0_i32 : i32
    %c1_i32 = arith.constant 1 : i32
    %3 = arith.select %2, %c1_i32, %c256_i32 : i32
    %4 = vector.broadcast %3 : i32 to vector<1x256xi32>
    %5 = arith.remsi %1, %4 : vector<1x256xi32>
    %c0_i32_1 = arith.constant 0 : i32
    %6 = vector.broadcast %c0_i32_1 : i32 to vector<1x256xi32>
    %7 = arith.cmpi ne, %5, %6 : vector<1x256xi32>
    %c0_i32_2 = arith.constant 0 : i32
    %8 = vector.broadcast %c0_i32_2 : i32 to vector<1x256xi32>
    %9 = arith.cmpi slt, %5, %8 : vector<1x256xi32>
    %c0_i32_3 = arith.constant 0 : i32
    %10 = arith.cmpi slt, %3, %c0_i32_3 : i32
    %11 = vector.broadcast %10 : i1 to vector<1x256xi1>
    %12 = vector.broadcast %11 : vector<1x256xi1> to vector<1x256xi1>
    %13 = arith.xori %9, %12 : vector<1x256xi1>
    %14 = arith.andi %13, %7 : vector<1x256xi1>
    %15 = vector.broadcast %3 : i32 to vector<1x256xi32>
    %16 = arith.addi %5, %15 : vector<1x256xi32>
    %17 = arith.select %14, %16, %5 : vector<1x256xi1>, vector<1x256xi32>
    %c16_i32 = arith.constant 16 : i32
    %c0_i32_4 = arith.constant 0 : i32
    %18 = arith.cmpi eq, %c16_i32, %c0_i32_4 : i32
    %c1_i32_5 = arith.constant 1 : i32
    %19 = arith.select %18, %c1_i32_5, %c16_i32 : i32
    %20 = vector.broadcast %19 : i32 to vector<1x256xi32>
    %21 = arith.remsi %1, %20 : vector<1x256xi32>
    %c0_i32_6 = arith.constant 0 : i32
    %22 = vector.broadcast %c0_i32_6 : i32 to vector<1x256xi32>
    %23 = arith.cmpi ne, %21, %22 : vector<1x256xi32>
    %c0_i32_7 = arith.constant 0 : i32
    %24 = vector.broadcast %c0_i32_7 : i32 to vector<1x256xi32>
    %25 = arith.cmpi slt, %21, %24 : vector<1x256xi32>
    %c0_i32_8 = arith.constant 0 : i32
    %26 = arith.cmpi slt, %19, %c0_i32_8 : i32
    %27 = vector.broadcast %26 : i1 to vector<1x256xi1>
    %28 = vector.broadcast %27 : vector<1x256xi1> to vector<1x256xi1>
    %29 = arith.xori %25, %28 : vector<1x256xi1>
    %30 = arith.andi %29, %23 : vector<1x256xi1>
    %31 = vector.broadcast %19 : i32 to vector<1x256xi32>
    %32 = arith.addi %21, %31 : vector<1x256xi32>
    %33 = arith.select %30, %32, %21 : vector<1x256xi1>, vector<1x256xi32>
    %c192_i32 = arith.constant 192 : i32
    %34 = vector.broadcast %c192_i32 : i32 to vector<1x256xi32>
    %35 = arith.cmpi sge, %17, %34 : vector<1x256xi32>
    %c64_i32 = arith.constant 64 : i32
    %36 = vector.broadcast %c64_i32 : i32 to vector<1x256xi32>
    %37 = arith.cmpi slt, %17, %36 : vector<1x256xi32>
    %c12_i32 = arith.constant 12 : i32
    %38 = vector.broadcast %c12_i32 : i32 to vector<1x256xi32>
    %39 = arith.cmpi sge, %33, %38 : vector<1x256xi32>
    %c4_i32 = arith.constant 4 : i32
    %40 = vector.broadcast %c4_i32 : i32 to vector<1x256xi32>
    %41 = arith.cmpi slt, %33, %40 : vector<1x256xi32>
    %42 = arith.andi %35, %39 : vector<1x256xi1>
    %43 = arith.andi %35, %41 : vector<1x256xi1>
    %44 = arith.andi %37, %39 : vector<1x256xi1>
    %45 = arith.andi %37, %41 : vector<1x256xi1>
    %c204_i32 = arith.constant 204 : i32
    %46 = tpu.dynamic_rotate %0 by %c204_i32 dim 1 : vector<8x256xf32>, i32 -> vector<8x256xf32>
    %cst = arith.constant 0.000000e+00 : f32
    %47 = vector.shape_cast %42 : vector<1x256xi1> to vector<1x256xi1>
    %48 = vector.broadcast %47 : vector<1x256xi1> to vector<8x256xi1>
    %49 = vector.broadcast %cst : f32 to vector<8x256xf32>
    %50 = arith.select %48, %46, %49 : vector<8x256xi1>, vector<8x256xf32>
    %c192_i32_9 = arith.constant 192 : i32
    %51 = tpu.dynamic_rotate %0 by %c192_i32_9 dim 1 : vector<8x256xf32>, i32 -> vector<8x256xf32>
    %cst_10 = arith.constant 0.000000e+00 : f32
    %52 = vector.shape_cast %35 : vector<1x256xi1> to vector<1x256xi1>
    %53 = vector.broadcast %52 : vector<1x256xi1> to vector<8x256xi1>
    %54 = vector.broadcast %cst_10 : f32 to vector<8x256xf32>
    %55 = arith.select %53, %51, %54 : vector<8x256xi1>, vector<8x256xf32>
    %c180_i32 = arith.constant 180 : i32
    %56 = tpu.dynamic_rotate %0 by %c180_i32 dim 1 : vector<8x256xf32>, i32 -> vector<8x256xf32>
    %cst_11 = arith.constant 0.000000e+00 : f32
    %57 = vector.shape_cast %43 : vector<1x256xi1> to vector<1x256xi1>
    %58 = vector.broadcast %57 : vector<1x256xi1> to vector<8x256xi1>
    %59 = vector.broadcast %cst_11 : f32 to vector<8x256xf32>
    %60 = arith.select %58, %56, %59 : vector<8x256xi1>, vector<8x256xf32>
    %c12_i32_12 = arith.constant 12 : i32
    %61 = tpu.dynamic_rotate %0 by %c12_i32_12 dim 1 : vector<8x256xf32>, i32 -> vector<8x256xf32>
    %cst_13 = arith.constant 0.000000e+00 : f32
    %62 = vector.shape_cast %39 : vector<1x256xi1> to vector<1x256xi1>
    %63 = vector.broadcast %62 : vector<1x256xi1> to vector<8x256xi1>
    %64 = vector.broadcast %cst_13 : f32 to vector<8x256xf32>
    %65 = arith.select %63, %61, %64 : vector<8x256xi1>, vector<8x256xf32>
    %c244_i32 = arith.constant 244 : i32
    %66 = tpu.dynamic_rotate %0 by %c244_i32 dim 1 : vector<8x256xf32>, i32 -> vector<8x256xf32>
    %cst_14 = arith.constant 0.000000e+00 : f32
    %67 = vector.shape_cast %41 : vector<1x256xi1> to vector<1x256xi1>
    %68 = vector.broadcast %67 : vector<1x256xi1> to vector<8x256xi1>
    %69 = vector.broadcast %cst_14 : f32 to vector<8x256xf32>
    %70 = arith.select %68, %66, %69 : vector<8x256xi1>, vector<8x256xf32>
    %c76_i32 = arith.constant 76 : i32
    %71 = tpu.dynamic_rotate %0 by %c76_i32 dim 1 : vector<8x256xf32>, i32 -> vector<8x256xf32>
    %cst_15 = arith.constant 0.000000e+00 : f32
    %72 = vector.shape_cast %44 : vector<1x256xi1> to vector<1x256xi1>
    %73 = vector.broadcast %72 : vector<1x256xi1> to vector<8x256xi1>
    %74 = vector.broadcast %cst_15 : f32 to vector<8x256xf32>
    %75 = arith.select %73, %71, %74 : vector<8x256xi1>, vector<8x256xf32>
    %c64_i32_16 = arith.constant 64 : i32
    %76 = tpu.dynamic_rotate %0 by %c64_i32_16 dim 1 : vector<8x256xf32>, i32 -> vector<8x256xf32>
    %cst_17 = arith.constant 0.000000e+00 : f32
    %77 = vector.shape_cast %37 : vector<1x256xi1> to vector<1x256xi1>
    %78 = vector.broadcast %77 : vector<1x256xi1> to vector<8x256xi1>
    %79 = vector.broadcast %cst_17 : f32 to vector<8x256xf32>
    %80 = arith.select %78, %76, %79 : vector<8x256xi1>, vector<8x256xf32>
    %c52_i32 = arith.constant 52 : i32
    %81 = tpu.dynamic_rotate %0 by %c52_i32 dim 1 : vector<8x256xf32>, i32 -> vector<8x256xf32>
    %cst_18 = arith.constant 0.000000e+00 : f32
    %82 = vector.shape_cast %45 : vector<1x256xi1> to vector<1x256xi1>
    %83 = vector.broadcast %82 : vector<1x256xi1> to vector<8x256xi1>
    %84 = vector.broadcast %cst_18 : f32 to vector<8x256xf32>
    %85 = arith.select %83, %81, %84 : vector<8x256xi1>, vector<8x256xf32>
    %86 = tpu.concatenate %50, %55, %60, %65, %0, %70, %75, %80, %85 in 0 : vector<8x256xf32>, vector<8x256xf32>, vector<8x256xf32>, vector<8x256xf32>, vector<8x256xf32>, vector<8x256xf32>, vector<8x256xf32>, vector<8x256xf32>, vector<8x256xf32> -> vector<72x256xf32>
    %87 = arith.truncf %86 : vector<72x256xf32> to vector<72x256xbf16>
    %c0_19 = arith.constant 0 : index
    %c0_20 = arith.constant 0 : index
    %88 = vector.load %arg2[%c0_19, %c0_20] : memref<16x72xbf16, #tpu.memory_space<vmem>>, vector<16x72xbf16>
    %cst_21 = arith.constant dense<0.000000e+00> : vector<16x256xf32>
    %89 = tpu.matmul %88, %87, %cst_21 {dimension_numbers = #tpu.dot_dimension_numbers<[1], [0], [0], [1], [0, 0, 1, 1], [], []>} : vector<16x72xbf16>, vector<72x256xbf16>, vector<16x256xf32> -> vector<16x256xf32>
    %c0_22 = arith.constant 0 : index
    %c0_23 = arith.constant 0 : index
    %90 = vector.load %arg3[%c0_22, %c0_23] : memref<16x1xf32, #tpu.memory_space<vmem>>, vector<16x1xf32>
    %91 = vector.broadcast %90 : vector<16x1xf32> to vector<16x256xf32>
    %92 = arith.addf %89, %91 : vector<16x256xf32>
    %cst_24 = arith.constant 0.000000e+00 : f32
    %93 = vector.broadcast %cst_24 : f32 to vector<16x256xf32>
    %94 = arith.maximumf %92, %93 : vector<16x256xf32>
    %c204_i32_25 = arith.constant 204 : i32
    %95 = tpu.dynamic_rotate %94 by %c204_i32_25 dim 1 : vector<16x256xf32>, i32 -> vector<16x256xf32>
    %cst_26 = arith.constant 0.000000e+00 : f32
    %96 = vector.shape_cast %42 : vector<1x256xi1> to vector<1x256xi1>
    %97 = vector.broadcast %96 : vector<1x256xi1> to vector<16x256xi1>
    %98 = vector.broadcast %cst_26 : f32 to vector<16x256xf32>
    %99 = arith.select %97, %95, %98 : vector<16x256xi1>, vector<16x256xf32>
    %c192_i32_27 = arith.constant 192 : i32
    %100 = tpu.dynamic_rotate %94 by %c192_i32_27 dim 1 : vector<16x256xf32>, i32 -> vector<16x256xf32>
    %cst_28 = arith.constant 0.000000e+00 : f32
    %101 = vector.shape_cast %35 : vector<1x256xi1> to vector<1x256xi1>
    %102 = vector.broadcast %101 : vector<1x256xi1> to vector<16x256xi1>
    %103 = vector.broadcast %cst_28 : f32 to vector<16x256xf32>
    %104 = arith.select %102, %100, %103 : vector<16x256xi1>, vector<16x256xf32>
    %c180_i32_29 = arith.constant 180 : i32
    %105 = tpu.dynamic_rotate %94 by %c180_i32_29 dim 1 : vector<16x256xf32>, i32 -> vector<16x256xf32>
    %cst_30 = arith.constant 0.000000e+00 : f32
    %106 = vector.shape_cast %43 : vector<1x256xi1> to vector<1x256xi1>
    %107 = vector.broadcast %106 : vector<1x256xi1> to vector<16x256xi1>
    %108 = vector.broadcast %cst_30 : f32 to vector<16x256xf32>
    %109 = arith.select %107, %105, %108 : vector<16x256xi1>, vector<16x256xf32>
    %c12_i32_31 = arith.constant 12 : i32
    %110 = tpu.dynamic_rotate %94 by %c12_i32_31 dim 1 : vector<16x256xf32>, i32 -> vector<16x256xf32>
    %cst_32 = arith.constant 0.000000e+00 : f32
    %111 = vector.shape_cast %39 : vector<1x256xi1> to vector<1x256xi1>
    %112 = vector.broadcast %111 : vector<1x256xi1> to vector<16x256xi1>
    %113 = vector.broadcast %cst_32 : f32 to vector<16x256xf32>
    %114 = arith.select %112, %110, %113 : vector<16x256xi1>, vector<16x256xf32>
    %c244_i32_33 = arith.constant 244 : i32
    %115 = tpu.dynamic_rotate %94 by %c244_i32_33 dim 1 : vector<16x256xf32>, i32 -> vector<16x256xf32>
    %cst_34 = arith.constant 0.000000e+00 : f32
    %116 = vector.shape_cast %41 : vector<1x256xi1> to vector<1x256xi1>
    %117 = vector.broadcast %116 : vector<1x256xi1> to vector<16x256xi1>
    %118 = vector.broadcast %cst_34 : f32 to vector<16x256xf32>
    %119 = arith.select %117, %115, %118 : vector<16x256xi1>, vector<16x256xf32>
    %c76_i32_35 = arith.constant 76 : i32
    %120 = tpu.dynamic_rotate %94 by %c76_i32_35 dim 1 : vector<16x256xf32>, i32 -> vector<16x256xf32>
    %cst_36 = arith.constant 0.000000e+00 : f32
    %121 = vector.shape_cast %44 : vector<1x256xi1> to vector<1x256xi1>
    %122 = vector.broadcast %121 : vector<1x256xi1> to vector<16x256xi1>
    %123 = vector.broadcast %cst_36 : f32 to vector<16x256xf32>
    %124 = arith.select %122, %120, %123 : vector<16x256xi1>, vector<16x256xf32>
    %c64_i32_37 = arith.constant 64 : i32
    %125 = tpu.dynamic_rotate %94 by %c64_i32_37 dim 1 : vector<16x256xf32>, i32 -> vector<16x256xf32>
    %cst_38 = arith.constant 0.000000e+00 : f32
    %126 = vector.shape_cast %37 : vector<1x256xi1> to vector<1x256xi1>
    %127 = vector.broadcast %126 : vector<1x256xi1> to vector<16x256xi1>
    %128 = vector.broadcast %cst_38 : f32 to vector<16x256xf32>
    %129 = arith.select %127, %125, %128 : vector<16x256xi1>, vector<16x256xf32>
    %c52_i32_39 = arith.constant 52 : i32
    %130 = tpu.dynamic_rotate %94 by %c52_i32_39 dim 1 : vector<16x256xf32>, i32 -> vector<16x256xf32>
    %cst_40 = arith.constant 0.000000e+00 : f32
    %131 = vector.shape_cast %45 : vector<1x256xi1> to vector<1x256xi1>
    %132 = vector.broadcast %131 : vector<1x256xi1> to vector<16x256xi1>
    %133 = vector.broadcast %cst_40 : f32 to vector<16x256xf32>
    %134 = arith.select %132, %130, %133 : vector<16x256xi1>, vector<16x256xf32>
    %135 = tpu.concatenate %99, %104, %109, %114, %94, %119, %124, %129, %134 in 0 : vector<16x256xf32>, vector<16x256xf32>, vector<16x256xf32>, vector<16x256xf32>, vector<16x256xf32>, vector<16x256xf32>, vector<16x256xf32>, vector<16x256xf32>, vector<16x256xf32> -> vector<144x256xf32>
    %136 = arith.truncf %135 : vector<144x256xf32> to vector<144x256xbf16>
    %c0_41 = arith.constant 0 : index
    %c0_42 = arith.constant 0 : index
    %137 = vector.load %arg4[%c0_41, %c0_42] : memref<4x144xbf16, #tpu.memory_space<vmem>>, vector<4x144xbf16>
    %cst_43 = arith.constant dense<0.000000e+00> : vector<4x256xf32>
    %138 = tpu.matmul %137, %136, %cst_43 {dimension_numbers = #tpu.dot_dimension_numbers<[1], [0], [0], [1], [0, 0, 1, 1], [], []>} : vector<4x144xbf16>, vector<144x256xbf16>, vector<4x256xf32> -> vector<4x256xf32>
    %c0_44 = arith.constant 0 : index
    %c0_45 = arith.constant 0 : index
    %139 = vector.load %arg5[%c0_44, %c0_45] : memref<4x1xf32, #tpu.memory_space<vmem>>, vector<4x1xf32>
    %140 = vector.broadcast %139 : vector<4x1xf32> to vector<4x256xf32>
    %141 = arith.addf %138, %140 : vector<4x256xf32>
    %c0_46 = arith.constant 0 : index
    %c0_47 = arith.constant 0 : index
    %142 = vector.load %arg11[%c0_46, %c0_47] : memref<4x256xf32, #tpu.memory_space<vmem>>, vector<4x256xf32>
    tpu.vector_store %arg11[%c0_46, %c0_47], %141 {strides = array<i32>} : memref<4x256xf32, #tpu.memory_space<vmem>>, vector<4x256xf32>,
    %c0_48 = arith.constant 0 : index
    %c0_49 = arith.constant 0 : index
    %143 = vector.load %arg6[%c0_48, %c0_49] : memref<16x4xbf16, #tpu.memory_space<vmem>>, vector<16x4xbf16>
    %144 = arith.truncf %141 : vector<4x256xf32> to vector<4x256xbf16>
    %cst_50 = arith.constant dense<0.000000e+00> : vector<16x256xf32>
    %145 = tpu.matmul %143, %144, %cst_50 {dimension_numbers = #tpu.dot_dimension_numbers<[1], [0], [0], [1], [0, 0, 1, 1], [], []>} : vector<16x4xbf16>, vector<4x256xbf16>, vector<16x256xf32> -> vector<16x256xf32>
    %c0_51 = arith.constant 0 : index
    %c0_52 = arith.constant 0 : index
    %146 = vector.load %arg7[%c0_51, %c0_52] : memref<16x1xf32, #tpu.memory_space<vmem>>, vector<16x1xf32>
    %147 = vector.broadcast %146 : vector<16x1xf32> to vector<16x256xf32>
    %148 = arith.addf %145, %147 : vector<16x256xf32>
    %cst_53 = arith.constant 0.000000e+00 : f32
    %149 = vector.broadcast %cst_53 : f32 to vector<16x256xf32>
    %150 = arith.maximumf %148, %149 : vector<16x256xf32>
    %151 = arith.addf %94, %150 : vector<16x256xf32>
    %c0_54 = arith.constant 0 : index
    %c0_55 = arith.constant 0 : index
    %152 = vector.load %arg8[%c0_54, %c0_55] : memref<8x16xbf16, #tpu.memory_space<vmem>>, vector<8x16xbf16>
    %153 = arith.truncf %151 : vector<16x256xf32> to vector<16x256xbf16>
    %cst_56 = arith.constant dense<0.000000e+00> : vector<8x256xf32>
    %154 = tpu.matmul %152, %153, %cst_56 {dimension_numbers = #tpu.dot_dimension_numbers<[1], [0], [0], [1], [0, 0, 1, 1], [], []>} : vector<8x16xbf16>, vector<16x256xbf16>, vector<8x256xf32> -> vector<8x256xf32>
    %c0_57 = arith.constant 0 : index
    %c0_58 = arith.constant 0 : index
    %155 = vector.load %arg9[%c0_57, %c0_58] : memref<8x1xf32, #tpu.memory_space<vmem>>, vector<8x1xf32>
    %156 = vector.broadcast %155 : vector<8x1xf32> to vector<8x256xf32>
    %157 = arith.addf %154, %156 : vector<8x256xf32>
    %cst_59 = arith.constant 0.000000e+00 : f32
    %158 = vector.broadcast %cst_59 : f32 to vector<8x256xf32>
    %159 = arith.maximumf %157, %158 : vector<8x256xf32>
    %160 = arith.addf %0, %159 : vector<8x256xf32>
    %c0_60 = arith.constant 0 : index
    %c0_61 = arith.constant 0 : index
    %161 = vector.load %arg10[%c0_60, %c0_61] : memref<8x256xf32, #tpu.memory_space<vmem>>, vector<8x256xf32>
    tpu.vector_store %arg10[%c0_60, %c0_61], %160 {strides = array<i32>} : memref<8x256xf32, #tpu.memory_space<vmem>>, vector<8x256xf32>,
    return
  }
  func.func @transform_0(%arg0: i32) -> (i32, i32) {
    %c0_i32 = arith.constant 0 : i32
    %c0_i32_0 = arith.constant 0 : i32
    return %c0_i32, %arg0 : i32, i32
  }
  func.func @transform_1(%arg0: i32) -> (i32, i32) {
    %c0_i32 = arith.constant 0 : i32
    %c0_i32_0 = arith.constant 0 : i32
    %c0_i32_1 = arith.constant 0 : i32
    return %c0_i32, %c0_i32_0 : i32, i32
  }
  func.func @transform_2(%arg0: i32) -> (i32, i32) {
    %c0_i32 = arith.constant 0 : i32
    %c0_i32_0 = arith.constant 0 : i32
    %c0_i32_1 = arith.constant 0 : i32
    return %c0_i32, %c0_i32_0 : i32, i32
  }
  func.func @transform_3(%arg0: i32) -> (i32, i32) {
    %c0_i32 = arith.constant 0 : i32
    %c0_i32_0 = arith.constant 0 : i32
    %c0_i32_1 = arith.constant 0 : i32
    return %c0_i32, %c0_i32_0 : i32, i32
  }
  func.func @transform_4(%arg0: i32) -> (i32, i32) {
    %c0_i32 = arith.constant 0 : i32
    %c0_i32_0 = arith.constant 0 : i32
    %c0_i32_1 = arith.constant 0 : i32
    return %c0_i32, %c0_i32_0 : i32, i32
  }
  func.func @transform_5(%arg0: i32) -> (i32, i32) {
    %c0_i32 = arith.constant 0 : i32
    %c0_i32_0 = arith.constant 0 : i32
    %c0_i32_1 = arith.constant 0 : i32
    return %c0_i32, %c0_i32_0 : i32, i32
  }
  func.func @transform_6(%arg0: i32) -> (i32, i32) {
    %c0_i32 = arith.constant 0 : i32
    %c0_i32_0 = arith.constant 0 : i32
    %c0_i32_1 = arith.constant 0 : i32
    return %c0_i32, %c0_i32_0 : i32, i32
  }
  func.func @transform_7(%arg0: i32) -> (i32, i32) {
    %c0_i32 = arith.constant 0 : i32
    %c0_i32_0 = arith.constant 0 : i32
    %c0_i32_1 = arith.constant 0 : i32
    return %c0_i32, %c0_i32_0 : i32, i32
  }
  func.func @transform_8(%arg0: i32) -> (i32, i32) {
    %c0_i32 = arith.constant 0 : i32
    %c0_i32_0 = arith.constant 0 : i32
    %c0_i32_1 = arith.constant 0 : i32
    return %c0_i32, %c0_i32_0 : i32, i32
  }
  func.func @transform_9(%arg0: i32) -> (i32, i32) {
    %c0_i32 = arith.constant 0 : i32
    %c0_i32_0 = arith.constant 0 : i32
    return %c0_i32, %arg0 : i32, i32
  }
  func.func @transform_10(%arg0: i32) -> (i32, i32) {
    %c0_i32 = arith.constant 0 : i32
    %c0_i32_0 = arith.constant 0 : i32
    return %c0_i32, %arg0 : i32, i32
  }
}

</mosaic_0001>

<bundles_post_ra>
// kernel: residual_covolution.1
= control target key start
LH: loop header
LB: loop body
LE: loop exit
PB: predicated region body
PF: predicated region fallthrough
CT: control target
= control target key end

     0   :  { %s1263_s13 = smov 0   ;;  %s1545_s0 = inlined_call_operand.vmem [shape: f32[8,512], index: 0, kind: input, shape index: {}]   ;;  %s1546_s1 = inlined_call_operand.vmem [shape: bf16[16,72], index: 1, kind: input, shape index: {}]   ;;  %s1547_s2 = inlined_call_operand.vmem [shape: f32[16,1], index: 2, kind: input, shape index: {}]   ;;  %s1548_s3 = inlined_call_operand.vmem [shape: bf16[4,144], index: 3, kind: input, shape index: {}]   ;;  %s1549_s4 = inlined_call_operand.vmem [shape: f32[4,1], index: 4, kind: input, shape index: {}]   ;;  %s1550_s5 = inlined_call_operand.vmem [shape: bf16[16,4], index: 5, kind: input, shape index: {}]   ;;  %s1551_s6 = inlined_call_operand.vmem [shape: f32[16,1], index: 6, kind: input, shape index: {}]   ;;  %s1552_s7 = inlined_call_operand.vmem [shape: bf16[8,16], index: 7, kind: input, shape index: {}]   ;;  %s1553_s8 = inlined_call_operand.vmem [shape: f32[8,1], index: 8, kind: input, shape index: {}]   ;;  %s1554_s9 = inlined_call_operand.vmem [shape: f32[8,512], index: 9, kind: output, shape index: {0}]   ;;  %s1555_s10 = inlined_call_operand.vmem [shape: f32[4,512], index: 10, kind: output, shape index: {1}]  }
   0x1 LB: > { %s1026_s14 = sadd.s32 4294967295, %s1197_s13   ;;  %p1030_p0 = scmp.ge.s32.totalorder %s1197_s13, 1  ;;  %s1197_s13 = sphi %s1263_s13, %s21_s13  }
   0x2   : > { %p316_p1 = scmp.lt.s32.totalorder %s1197_s13, 3 }
   0x4   : > { %p317_p2 = pnand %p1030_p0, %p316_p1 }
   0x5   : > { %s1031_s15 = sshll.u32 (!%p317_p2), %s1026_s14, 1  ;;  %s1199_s20 = smov (!%p317_p2), 52   ;;  %v1204_v3 = vmov (!%p317_p2), 0   ;;  %v542_v4 = vld [vmem:[%s1547_s2] sm:$0xff] (!%p317_p2)  ;;  %v543_v5 = vld [vmem:[%s1547_s2 + $0x8] sm:$0xff] (!%p317_p2)  ;;  %v380_v6 = vlaneseq (!%p317_p2)  ;;  %v1205_v41 = vmov (!%p317_p2), 0.0  }
   0x6   : > { %320 = sbr.rel (%p317_p2) target bundleno = 1211 (0x4bb), region = 56  ;;  %p360_p3 = scmp.lt.s32.totalorder (!%p317_p2), %s1031_s15, 3  ;;  %602 = vmatprep.mubr.bf16.mxu0 (!%p317_p2), %v1204_v3  ;;  %1137 = vset.pattern.permute.xlu1 (!%p317_p2), %v1204_v3  ;;  %v1206_v43 = vmov (!%p317_p2), 0.0|0.0   ;;  %vm1207_vm13 = vmmov (!%p317_p2), 1   ;;  %v1189_v55 = vld [vmem:[%s1546_s1] sm:$0xff] (!%p317_p2)  }
   0x7   : > { %s1200_s21 = smov (!%p317_p2), 76   ;;  %s1201_s22 = smov (!%p317_p2), 12   ;;  %1138 = vset.pattern.permute.xlu0 (!%p317_p2), %v1204_v3  ;;  %v1299_v7 = vand.u32 (!%p317_p2), 127, %v380_v6 }
   0x8   : > { %s1202_s23 = smov (!%p317_p2), 64   ;;  %s1203_s24 = smov (!%p317_p2), 116  }
   0x9   : > { %v382_v8 = vadd.s32 (!%p317_p2), 128, %v1299_v7  ;;  %vm1558_vm3 = vcmp.lt.s32.totalorder (!%p317_p2), %v1299_v7, 52  ;;  %vm1556_vm4 = vcmp.lt.s32.totalorder (!%p317_p2), %v1299_v7, 12  ;;  %vm451_vm6 = vcmp.lt.s32.totalorder (!%p317_p2), %v1299_v7, 76 }
   0xa   : > { %vm464_vm7 = vcmp.lt.s32.totalorder (!%p317_p2), %v1299_v7, 64  ;;  %v411_v28 = vand.u32 (!%p317_p2), 15, %v1299_v7  ;;  %v387_v29 = vand.u32 (!%p317_p2), 255, %v1299_v7  ;;  %vm1557_vm10 = vcmp.lt.s32.totalorder (!%p317_p2), %v1299_v7, 116 }
   0xb   : > { %v394_v9 = vand.u32 (!%p317_p2), 255, %v382_v8  ;;  %v418_v10 = vand.u32 (!%p317_p2), 15, %v382_v8 }
   0xc   : > { %vm1355_vm12 = vcmp.ge.s32.totalorder (!%p317_p2), %v411_v28, 12  ;;  %vm1367_vm15 = vcmp.lt.s32.totalorder (!%p317_p2), %v411_v28, 4 }
   0xd   : > { %s1590_s15 = smov (!%p360_p3, %s1031_s15), 3  ;;  %vm1302_vm0 = vcmp.ge.s32.totalorder %v394_v9, 192  ;;  %vm1306_vm1 = vcmp.ge.s32.totalorder %v418_v10, 12  ;;  %vm1310_vm2 = vcmp.lt.s32.totalorder %v418_v10, 4  ;;  %vm1044_vm14 = vmpackc.low %vm1355_vm12, %vm1207_vm13 }
   0xe   : > { %s1032_s16 = sshll.u32 %s1590_s15, 3  ;;  %vm1320_vm5 = vmand %vm1302_vm0, %vm1306_vm1 }
   0xf   : > { %s363_s19 = scalar_lea.vmem %s1545_s0, %s1032_s16  ;;  %vm1330_vm8 = vmand %vm1302_vm0, %vm1310_vm2  ;;  %s369_s17 = scalar_lea.vmem %s1554_s9, %s1032_s16 }
  0x10   : > { %v1279_v0 = vld [vmem:[%s363_s19] sm:$0xff]  ;;  %v1281_v1 = vld [vmem:[%s363_s19 + $0x8] sm:$0xff]  ;;  %vm1038_vm9 = vmpackc.low %vm1302_vm0, %vm1320_vm5 }
  0x11   : > { %v1122_v2 = vpack.i.bf16 %v1281_v1, %v1279_v0  ;;  %vm1041_vm11 = vmpackc.low %vm1306_vm1, %vm1330_vm8 }
  0x13   : > { %1123 = vrot.lane.b32.xlu1 %v1122_v2, %s1199_s20  ;;  %1113 = vrot.lane.b32.xlu0 %v1122_v2, %s1200_s21 }
  0x17   : > { %1128 = vrot.lane.b32.xlu1 %v1122_v2, %s1201_s22  ;;  %1118 = vrot.lane.b32.xlu0 %v1122_v2, %s1202_s23 }
  0x1b   : > { %1133 = vrot.lane.b32.xlu0 %v1122_v2, %s1203_s24  ;;  %546 = vperm.xlu1 %1137, %v542_v4  }
  0x1f   : > { %551 = vperm.xlu0 %1138, %v543_v5  }
  0x85   : > { %v1124_v11 = vpop.permute.xlu1 %1123  ;;  %v1114_v12 = vpop.permute.xlu0 %1113 }
  0x86   : > { %v1126_v16 = vunpack.i.h.bf16 %v1124_v11  ;;  %v1125_v17 = vunpack.i.l.bf16 %v1124_v11  ;;  %v1116_v18 = vunpack.i.h.bf16 %v1114_v12  ;;  %v1115_v19 = vunpack.i.l.bf16 %v1114_v12  ;;  %v728_v12 = vld [vmem:[%s1549_s4] sm:$0xf] }
  0x88   : > { %v479_v30 = vsel %vm1558_vm3, %v1126_v16, %v1125_v17  ;;  %v453_v32 = vsel %vm451_vm6, %v1116_v18, %v1115_v19  ;;  %v799_v16 = vld [vmem:[%s1551_s6 + $0x8] sm:$0xff]  ;;  %v798_v17 = vld [vmem:[%s1551_s6] sm:$0xff] }
  0x89   : > { %v1129_v20 = vpop.permute.xlu1 %1128  ;;  %v1119_v21 = vpop.permute.xlu0 %1118  ;;  %v880_v18 = vld [vmem:[%s1553_s8] sm:$0xff] }
  0x8a   : > { %v1131_v23 = vunpack.i.h.bf16 %v1129_v20  ;;  %v1130_v24 = vunpack.i.l.bf16 %v1129_v20  ;;  %v1121_v25 = vunpack.i.h.bf16 %v1119_v21  ;;  %v1120_v26 = vunpack.i.l.bf16 %v1119_v21  ;;  %v1445_v19 = vld.sshfl [vmem:[%s1548_s3] sm:$0x33 pattern:$0x76325410] }
  0x8b   : > { %v742_v20 = vcombine.high %v1445_v19, %v1445_v19 }
  0x8c   : > { %v491_v31 = vsel %vm1556_vm4, %v1130_v24, %v1131_v23  ;;  %v466_v33 = vsel %vm464_vm7, %v1121_v25, %v1120_v26  ;;  %v492_v34 = vsel %vm1556_vm4, %v1131_v23, %v1130_v24  ;;  %vm1047_vm4 = vmpackc.low %vm1310_vm2, %vm1207_vm13 }
  0x8d   : > { %v1039_v35 = vpack.c.bf16 %v466_v33, %v453_v32  ;;  %v1134_v36 = vpop.permute.xlu0 %1133  ;;  %v1042_v40 = vpack.c.bf16 %v491_v31, %v479_v30  ;;  %v1045_v42 = vpack.c.bf16 %v492_v34, %v1205_v41 }
  0x8e   : > { %v1136_v37 = vunpack.i.h.bf16 %v1134_v36  ;;  %v1135_v38 = vunpack.i.l.bf16 %v1134_v36 }
  0x8f   : > { %1040 = vmatprep.subr.msk.bf16.mxu0 %vm1038_vm9, %v1039_v35  ;;  %vm1371_vm9 = vcmp.lt.s32.totalorder %v387_v29, 64 }
  0x90   : > { %571 = vmatpush1.bf16.msra.mxu0 %v1206_v43  ;;  %v505_v44 = vsel %vm1557_vm10, %v1136_v37, %v1135_v38  ;;  %v504_v45 = vsel %vm1557_vm10, %v1135_v38, %v1136_v37  ;;  %vm1050_vm10 = vmpackc.low %vm1367_vm15, %vm1207_vm13  ;;  %vm563_vm13 = vcmask 1043456  }
  0x91   : > { %v1048_v46 = vpack.c.bf16 %v505_v44, %v1281_v1  ;;  %1043 = vmatprep.subr.msk.bf16.mxu0 %vm1041_vm11, %v1042_v40  ;;  %v1051_v49 = vpack.c.bf16 %v504_v45, %v1279_v0  ;;  %vm1382_vm11 = vmand %vm1371_vm9, %vm1367_vm15 }
  0x92   : > { %vm1392_vm3 = vmand %vm1371_vm9, %vm1355_vm12  ;;  %v528_v52 = vsel %vm1382_vm11, %v479_v30, 0.0 }
  0x93   : > { %v538_v53 = vpack.c.bf16 %v528_v52, %v528_v52 }
  0x94   : > { %1046 = vmatpush1.bf16.msk.msra.mxu0 %vm1044_vm14, %v1045_v42  ;;  %vm744_vm14 = vcmask 130048  }
  0x95   : > { %1049 = vmatprep.subr.msk.bf16.mxu0 %vm1047_vm4, %v1048_v46  ;;  %vm1053_vm4 = vmpackc.low %vm1371_vm9, %vm1392_vm3  ;;  %v565_v54 = vsel %vm563_vm13, %v538_v53, 0  ;;  %1088 = vmatprep.mubr.msk.bf16.mxu1 %vm744_vm14, %v742_v20 }
  0x98   : > { %1052 = vmatpush1.bf16.msk.msra.mxu0 %vm1050_vm10, %v1051_v49  ;;  %vm559_vm10 = vcmask 588800  }
  0x99   : > { %576 = vmatprep.subr.bf16.mxu0 %v1206_v43 }
  0x9a   : > { %v547_v56 = vpop.permute.xlu1 %546 }
  0x9c   : > { %1055 = vmatpush1.bf16.msk.msra.mxu0 %vm1053_vm4, %v1039_v35  ;;  %vm1058_vm4 = vmpackc.low %vm1320_vm5, %vm1320_vm5  ;;  %vm1579_vm5 = vcmp.lt.s32.totalorder %v1299_v7, 52 }
  0x9d   : > { %578 = vmatprep.subr.bf16.mxu0 %v1206_v43  ;;  %vm1580_vm13 = vmmov %vm1579_vm5 }
  0x9e   : > { %v552_v58 = vpop.permute.xlu0 %551 }
  0xa0   : > { %579 = vmatpush1.bf16.msra.mxu0 %v565_v54 }
  0xa3   : > { %1056 = vmatmul.mubr.msk.bf16.vlgmr.msra.gmra.mrb[0].mxu0 %vm559_vm10, %v1189_v55 }
  0xa4   : > { %858 = vmatprep.mubr.bf16.mxu0 %v1204_v3 }
 0x176   : > { %v604_v57 = vpop.f32.mrb[0].mxu0 }
 0x177   : > { %v605_v59 = vadd.f32 %v604_v57, %v547_v56  ;;  %v606_v60 = vpop.f32.mrb[1].mxu0 }
 0x178   : > { %v608_v61 = vpop.f32.mrb[2].mxu0  ;;  %v607_v5 = vadd.f32 %v606_v60, %v547_v56 }
 0x179   : > { %v609_v62 = vadd.f32 %v608_v61, %v552_v58  ;;  %v610_v63 = vpop.f32.mrb[3].mxu0  ;;  %v1408_v4 = vmax.f32 %v605_v59, 0.0 }
 0x17a   : > { %v611_v2 = vadd.f32 %v610_v63, %v552_v58  ;;  %v1416_v10 = vmax.f32 %v607_v5, 0.0 }
 0x17b   : > { %v1410_v6 = vmax.f32 %v609_v62, 0.0 }
 0x17c   : > { %v1412_v8 = vmax.f32 %v611_v2, 0.0 }
 0x17d   : > { %v1144_v9 = vpack.i.bf16 %v1410_v6, %v1408_v4  ;;  %v717_v39 = vpack.c.bf16 %v1410_v6, %v1408_v4 }
 0x17e   : > { %v1159_v11 = vpack.i.bf16 %v1412_v8, %v1416_v10 }
 0x17f   : > { %1145 = vrot.lane.b32.xlu0 %v1144_v9, %s1202_s23  ;;  %1140 = vrot.lane.b32.xlu1 %v1144_v9, %s1200_s21 }
 0x183   : > { %1150 = vrot.lane.b32.xlu0 %v1144_v9, %s1199_s20  ;;  %1160 = vrot.lane.b32.xlu1 %v1159_v11, %s1200_s21 }
 0x187   : > { %1155 = vrot.lane.b32.xlu0 %v1144_v9, %s1201_s22  ;;  %1165 = vrot.lane.b32.xlu1 %v1159_v11, %s1202_s23 }
 0x18b   : > { %1180 = vrot.lane.b32.xlu0 %v1144_v9, %s1203_s24  ;;  %1170 = vrot.lane.b32.xlu1 %v1159_v11, %s1199_s20 }
 0x18f   : > { %731 = vperm.xlu0 %1138, %v728_v12   ;;  %1175 = vrot.lane.b32.xlu1 %v1159_v11, %s1201_s22  ;;  %s1036_s22 = sshll.u32 %s1590_s15, 2 }
 0x190   : > { %s375_s27 = scalar_lea.vmem %s1555_s10, %s1036_s22 }
 0x193   : > { %807 = vperm.xlu0 %1138, %v799_v16   ;;  %1185 = vrot.lane.b32.xlu1 %v1159_v11, %s1203_s24 }
 0x197   : > { %802 = vperm.xlu1 %1137, %v798_v17  }
 0x19b   : > { %883 = vperm.xlu1 %1137, %v880_v18   ;;  %v718_v18 = vpack.c.bf16 %v1412_v8, %v1416_v10 }
 0x1f1   : > { %v1146_v21 = vpop.permute.xlu0 %1145  ;;  %v1141_v23 = vpop.permute.xlu1 %1140 }
 0x1f2   : > { %v1143_v25 = vunpack.i.h.bf16 %v1141_v23  ;;  %v1142_v26 = vunpack.i.l.bf16 %v1141_v23  ;;  %v1148_v35 = vunpack.i.h.bf16 %v1146_v21  ;;  %v1147_v36 = vunpack.i.l.bf16 %v1146_v21 }
 0x1f5   : > { %v1161_v24 = vpop.permute.xlu1 %1160  ;;  %v1151_v30 = vpop.permute.xlu0 %1150 }
 0x1f6   : > { %v1163_v28 = vunpack.i.h.bf16 %v1161_v24  ;;  %v1162_v29 = vunpack.i.l.bf16 %v1161_v24  ;;  %v1153_v45 = vunpack.i.h.bf16 %v1151_v30  ;;  %v1152_v46 = vunpack.i.l.bf16 %v1151_v30 }
 0x1f8   : > { %v627_v31 = vsel %vm451_vm6, %v1162_v29, %v1142_v26  ;;  %v628_v32 = vsel %vm451_vm6, %v1163_v28, %v1143_v25  ;;  %vm1061_vm6 = vmpackc.low %vm1302_vm0, %vm1302_vm0 }
 0x1f9   : > { %v1166_v33 = vpop.permute.xlu1 %1165  ;;  %v1059_v34 = vpack.c.bf16 %v628_v32, %v627_v31  ;;  %v1156_v22 = vpop.permute.xlu0 %1155  ;;  %vm1064_vm0 = vmpackc.low %vm1330_vm8, %vm1330_vm8 }
 0x1fa   : > { %v1168_v37 = vunpack.i.h.bf16 %v1166_v33  ;;  %v1167_v38 = vunpack.i.l.bf16 %v1166_v33  ;;  %v1158_v56 = vunpack.i.h.bf16 %v1156_v22  ;;  %v1157_v57 = vunpack.i.l.bf16 %v1156_v22  ;;  %vm1067_vm8 = vmpackc.low %vm1306_vm1, %vm1306_vm1 }
 0x1fb   : > { %1060 = vmatprep.subr.msk.bf16.mxu1 %vm1058_vm4, %v1059_v34 }
 0x1fc   : > { %v644_v40 = vsel %vm464_vm7, %v1168_v37, %v1148_v35  ;;  %v643_v41 = vsel %vm464_vm7, %v1167_v38, %v1147_v36  ;;  %749 = vmatpush1.bf16.msra.mxu1 %v1206_v43  ;;  %vm1581_vm7 = vcmp.lt.s32.totalorder %v1299_v7, 12 }
 0x1fd   : > { %v1062_v42 = vpack.c.bf16 %v644_v40, %v643_v41  ;;  %v1171_v44 = vpop.permute.xlu1 %1170  ;;  %v1181_v60 = vpop.permute.xlu0 %1180  ;;  %vm1582_vm10 = vmmov %vm1581_vm7 }
 0x1fe   : > { %v1173_v49 = vunpack.i.h.bf16 %v1171_v44  ;;  %v1172_v52 = vunpack.i.l.bf16 %v1171_v44  ;;  %vm1583_vm4 = vmmov %vm1581_vm7  ;;  %v1183_v11 = vunpack.i.h.bf16 %v1181_v60  ;;  %v1182_v12 = vunpack.i.l.bf16 %v1181_v60 }
 0x1ff   : > { %1063 = vmatprep.subr.msk.bf16.mxu1 %vm1061_vm6, %v1062_v42  ;;  %vm1584_vm6 = vmmov %vm1583_vm4 }
 0x200   : > { %v660_v53 = vsel %vm1579_vm5, %v1173_v49, %v1153_v45  ;;  %v659_v54 = vsel %vm1580_vm13, %v1172_v52, %v1152_v46  ;;  %751 = vmatpush1.bf16.msra.mxu1 %v1206_v43  ;;  %vm1070_vm5 = vmpackc.low %vm1355_vm12, %vm1355_vm12  ;;  %vm1585_vm13 = vcmp.lt.s32.totalorder %v1299_v7, 116 }
 0x201   : > { %v1065_v13 = vpack.c.bf16 %v660_v53, %v659_v54  ;;  %v1176_v55 = vpop.permute.xlu1 %1175  ;;  %vm1586_vm1 = vmmov %vm1585_vm13 }
 0x202   : > { %v1178_v58 = vunpack.i.h.bf16 %v1176_v55  ;;  %v1177_v59 = vunpack.i.l.bf16 %v1176_v55  ;;  %vm1073_vm12 = vmpackc.low %vm1310_vm2, %vm1310_vm2 }
 0x203   : > { %1066 = vmatprep.subr.msk.bf16.mxu1 %vm1064_vm0, %v1065_v13  ;;  %vm1587_vm0 = vmmov %vm1586_vm1 }
 0x204   : > { %v674_v61 = vsel %vm1581_vm7, %v1158_v56, %v1178_v58  ;;  %v676_v62 = vsel %vm1582_vm10, %v1178_v58, %v1158_v56  ;;  %v673_v63 = vsel %vm1583_vm4, %v1157_v57, %v1177_v59  ;;  %v675_v27 = vsel %vm1584_vm6, %v1177_v59, %v1157_v57  ;;  %753 = vmatpush1.bf16.msra.mxu1 %v1206_v43  ;;  %vm1588_vm7 = vmmov %vm1587_vm0 }
 0x205   : > { %v1068_v2 = vpack.c.bf16 %v674_v61, %v673_v63  ;;  %v1071_v5 = vpack.c.bf16 %v676_v62, %v675_v27  ;;  %v1186_v9 = vpop.permute.xlu1 %1185  ;;  %vm1076_vm10 = vmpackc.low %vm1367_vm15, %vm1367_vm15 }
 0x206   : > { %v1188_v16 = vunpack.i.h.bf16 %v1186_v9  ;;  %v1187_v17 = vunpack.i.l.bf16 %v1186_v9  ;;  %vm1079_vm2 = vmpackc.low %vm1392_vm3, %vm1392_vm3  ;;  %vm819_vm3 = vcmask 1041408  }
 0x207   : > { %1069 = vmatprep.subr.msk.bf16.mxu1 %vm1067_vm8, %v1068_v2  ;;  %vm1082_vm4 = vmpackc.low %vm1371_vm9, %vm1371_vm9  ;;  %vm815_vm9 = vcmask 31744  }
 0x208   : > { %v692_v14 = vsel %vm1585_vm13, %v1188_v16, %v1183_v11  ;;  %v691_v20 = vsel %vm1586_vm1, %v1187_v17, %v1182_v12  ;;  %1072 = vmatpush1.bf16.msk.msra.mxu1 %vm1070_vm5, %v1071_v5  ;;  %v690_v21 = vsel %vm1587_vm0, %v1183_v11, %v1188_v16  ;;  %v689_v23 = vsel %vm1588_vm7, %v1182_v12, %v1187_v17  ;;  %vm1085_vm15 = vmpackc.low %vm1382_vm11, %vm1382_vm11 }
 0x209   : > { %756 = vmatprep.subr.bf16.mxu1 %v718_v18  ;;  %v1074_v24 = vpack.c.bf16 %v692_v14, %v691_v20  ;;  %v1077_v25 = vpack.c.bf16 %v690_v21, %v689_v23 }
 0x20c   : > { %757 = vmatpush1.bf16.msra.mxu1 %v717_v39 }
 0x20d   : > { %1075 = vmatprep.subr.msk.bf16.mxu1 %vm1073_vm12, %v1074_v24 }
 0x20e   : > { %v732_v7 = vpop.permute.xlu0 %731 }
 0x210   : > { %1078 = vmatpush1.bf16.msk.msra.mxu1 %vm1076_vm10, %v1077_v25 }
 0x211   : > { %760 = vmatprep.subr.bf16.mxu1 %v1206_v43 }
 0x212   : > { %v808_v35 = vpop.permute.xlu0 %807 }
 0x214   : > { %1081 = vmatpush1.bf16.msk.msra.mxu1 %vm1079_vm2, %v1059_v34 }
 0x215   : > { %762 = vmatprep.subr.bf16.mxu1 %v1206_v43 }
 0x216   : > { %v803_v31 = vpop.permute.xlu1 %802 }
 0x218   : > { %1084 = vmatpush1.bf16.msk.msra.mxu1 %vm1082_vm4, %v1062_v42 }
 0x219   : > { %764 = vmatprep.subr.bf16.mxu1 %v1206_v43 }
 0x21a   : > { %v884_v55 = vpop.permute.xlu1 %883 }
 0x21c   : > { %1087 = vmatpush1.bf16.msk.msra.mxu1 %vm1085_vm15, %v1065_v13  ;;  %v877_v13 = vld [vmem:[%s1552_s7] sm:$0xf] }
 0x21f   : > { %781 = vmatmul.mubr.bf16.vlgmr.msra.gmra.mrb[0].mxu1 %v1445_v19  ;;  %v1190_v19 = vld [vmem:[%s1550_s5] sm:$0xff]  }
 0x2f2   : > { %v782_v15 = vpop.f32.mrb[0].mxu1 }
 0x2f3   : > { %v783_v47 = vadd.f32 %v782_v15, %v732_v7  ;;  %v784_v51 = vpop.f32.mrb[1].mxu1 }
 0x2f4   : > { %v785_v26 = vadd.f32 %v784_v51, %v732_v7  ;;  %v786_v28 = vpop.f32.mrb[2].mxu1 }
 0x2f5   : > { %v796_v48 = vpack.c.bf16 %v783_v47, %v783_v47  ;;  %v787_v43 = vpop.f32.mrb[3].mxu1 }
 0x2f6   : > { %v791_v50 = vcombine.low %v783_v47, %v785_v26  ;;  %v797_v29 = vpack.c.bf16 %v785_v26, %v785_v26 }
 0x2f7   : > { %v821_v30 = vsel %vm819_vm3, %v796_v48, 0 }
 0x2f8   : > { %793 = vst [vmem:[%s375_s27] sm:$0xff] %v791_v50  ;;  %1090 = vmatprep.subr.msk.bf16.mxu0 %vm819_vm3, %v797_v29 }
 0x2f9   : > { %827 = vmatpush1.bf16.msra.mxu0 %v821_v30 }
 0x2fc   : > { %1091 = vmatmul.mubr.msk.bf16.vlgmr.msra.gmra.mrb[4].mxu0 %vm815_vm9, %v1190_v19 }
 0x2fd   : > { %921 = vmatprep.mubr.bf16.mxu0 %v1204_v3 }
 0x3cf   : > { %v860_v32 = vpop.f32.mrb[4].mxu0 }
 0x3d0   : > { %v861_v33 = vadd.f32 %v860_v32, %v803_v31  ;;  %v862_v34 = vpop.f32.mrb[5].mxu0 }
 0x3d1   : > { %v863_v36 = vadd.f32 %v862_v34, %v803_v31  ;;  %v864_v37 = vpop.f32.mrb[6].mxu0 }
 0x3d2   : > { %v869_v38 = vmax.f32 %v861_v33, 0.0  ;;  %v865_v40 = vadd.f32 %v864_v37, %v808_v35  ;;  %v866_v41 = vpop.f32.mrb[7].mxu0 }
 0x3d3   : > { %v870_v22 = vmax.f32 %v863_v36, 0.0  ;;  %v867_v42 = vadd.f32 %v866_v41, %v808_v35 }
 0x3d4   : > { %v871_v44 = vmax.f32 %v865_v40, 0.0  ;;  %v873_v46 = vadd.f32 %v869_v38, %v1408_v4 }
 0x3d5   : > { %v872_v45 = vmax.f32 %v867_v42, 0.0  ;;  %v874_v3 = vadd.f32 %v870_v22, %v1416_v10 }
 0x3d6   : > { %v875_v49 = vadd.f32 %v871_v44, %v1410_v6 }
 0x3d7   : > { %v876_v52 = vadd.f32 %v872_v45, %v1412_v8 }
 0x3d8   : > { %v878_v53 = vpack.c.bf16 %v875_v49, %v873_v46 }
 0x3d9   : > { %v879_v54 = vpack.c.bf16 %v876_v52, %v874_v3 }
 0x3db   : > { %889 = vmatprep.subr.bf16.mxu0 %v879_v54 }
 0x3dc   : > { %890 = vmatpush1.bf16.msra.mxu0 %v878_v53 }
 0x3df   : > { %1092 = vmatmul.mubr.msk.bf16.vlgmr.msra.gmra.mrb[8].mxu0 %vm744_vm14, %v877_v13 }
 0x4b2   : > { %v923_v56 = vpop.f32.mrb[8].mxu0 }
 0x4b3   : > { %v924_v4 = vadd.f32 %v923_v56, %v884_v55  ;;  %v925_v57 = vpop.f32.mrb[9].mxu0 }
 0x4b4   : > { %v926_v6 = vadd.f32 %v925_v57, %v884_v55  ;;  %v927_v58 = vpop.f32.mrb[10].mxu0 }
 0x4b5   : > { %v930_v10 = vmax.f32 %v924_v4, 0.0  ;;  %v928_v59 = vpop.f32.mrb[11].mxu0 }
 0x4b6   : > { %v931_v8 = vmax.f32 %v926_v6, 0.0 }
 0x4b7   : > { %v932_v60 = vadd.f32 %v930_v10, %v1279_v0 }
 0x4b8   : > { %v933_v61 = vadd.f32 %v931_v8, %v1281_v1 }
 0x4b9   : > { %934 = vst [vmem:[%s369_s17] sm:$0xff] %v932_v60 }
 0x4ba   : > { %935 = vst [vmem:[%s369_s17 + $0x8] sm:$0xff] %v933_v61 }
 0x4bb PF: > { %s21_s13 = sadd.s32 1, %s1197_s13  }
 0x4bc   : > { %p18_p4 = scmp.ge.s32.totalorder %s21_s13, 4  }
 0x4be   :  { %20 = sbr.rel (!%p18_p4) target bundleno = 1 (0x1), region = 98 }

</bundles_post_ra>
